<compile_context>
chip_gen: v5e
topology: v5e:2x2
jax: 0.10.0
libtpu: 0.0.40
codegen_flags: <defaults>
</compile_context>

<pallas_src>
import functools

import jax
import jax.numpy as jnp
from jax.experimental import pallas as pl
from jax.experimental.pallas import tpu as pltpu

HID_LAYER1_DIM = 256
HID_LAYER2_DIM = 128
WFINAL = 0.003
BN_EPS = 1e-5
LANE = 128          # action dim padded to this -> lane-dense (unmasked) output store
SUBLANE_PACK = 16   # bf16 sublane packing: fc1 contraction dim padded to this
VEC_ROWS = 16       # sublane-padded row count of the packed parameter slab


def _round_up(n, m):
    return ((n + m - 1) // m) * m


def _batchnorm(x, gamma, beta):
    # BatchNorm1d (training mode): batch statistics, biased variance, f32 math.
    mean = jnp.mean(x, axis=0, keepdims=True)
    diff = x - mean
    var = jnp.mean(diff * diff, axis=0, keepdims=True)
    return diff * jax.lax.rsqrt(var + BN_EPS) * gamma + beta


def actor_kernel(x_ref, w1_ref, w2_ref, w3_ref, vec_ref, out_ref):
    # Shapes (padded in prepare_params):
    #   x_ref  : (B, SP)   f32      SP = stateDim rounded up to 16
    #   w1_ref : (SP, H1)  bf16
    #   w2_ref : (H1, H2)  bf16
    #   w3_ref : (H2, AP)  f32      AP = actionDim rounded up to 128
    #   vec_ref: (16, VW)  f32      packed per-feature params (zero-padded)
    #   out_ref: (B, AP)   f32
    sp = x_ref.shape[1]
    h1d = w1_ref.shape[1]
    h2d = w2_ref.shape[1]
    ap = out_ref.shape[1]

    # Slice parameter rows directly off the packed ref (static slices).
    g0, b0 = vec_ref[0:1, :sp], vec_ref[1:2, :sp]
    bias1, g1, b1 = vec_ref[2:3, :h1d], vec_ref[3:4, :h1d], vec_ref[4:5, :h1d]
    bias2, g2, b2 = vec_ref[5:6, :h2d], vec_ref[6:7, :h2d], vec_ref[7:8, :h2d]
    bias3 = vec_ref[8:9, :ap]

    x = x_ref[...]

    # norm0 (f32 VPU math; padded lanes stay exactly zero — see invariant above)
    ip_norm = _batchnorm(x, g0, b0)

    # fc1 + ReLU  (bf16 MXU operands, f32 accumulation)
    h1 = jnp.dot(ip_norm.astype(jnp.bfloat16), w1_ref[...],
                 preferred_element_type=jnp.float32)
    h1 = jnp.maximum(h1 + bias1, 0.0)

    # bn1
    h1_norm = _batchnorm(h1, g1, b1)

    # fc2 + ReLU
    h2 = jnp.dot(h1_norm.astype(jnp.bfloat16), w2_ref[...],
                 preferred_element_type=jnp.float32)
    h2 = jnp.maximum(h2 + bias2, 0.0)

    # bn2
    h2_norm = _batchnorm(h2, g2, b2)

    # fc3 + Tanh — full f32 (tiny matmul; final layer is the precision-weak link)
    a = jnp.dot(h2_norm, w3_ref[...], preferred_element_type=jnp.float32)
    out_ref[...] = jnp.tanh(a + bias3).astype(out_ref.dtype)


def prepare_params(params):
    """One-time preprocessing: pad + cast weights, pack per-feature vectors.

    Returns (prepared_pytree, action_dim).  Call once and reuse the result for
    every forward — this removes all per-call parameter re-packing work.
    """
    state_dim, h1d = params["w1"].shape
    h2d, action_dim = params["w3"].shape

    sp = _round_up(state_dim, SUBLANE_PACK)  # bf16 sublane pack for fc1's K dim
    ap = _round_up(action_dim, LANE)         # lane-dense output store
    vw = max(h1d, sp, ap)                    # width of the packed parameter slab

    w1 = jnp.pad(params["w1"].astype(jnp.float32),
                 ((0, sp - state_dim), (0, 0))).astype(jnp.bfloat16)
    w2 = params["w2"].astype(jnp.bfloat16)
    # Keep w3 (|w| <= WFINAL) in f32: avoids bf16 rounding on the final layer.
    w3 = jnp.pad(params["w3"].astype(jnp.float32),
                 ((0, 0), (0, ap - action_dim)))

    def row(v):
        v = jnp.reshape(v, (-1,)).astype(jnp.float32)
        return jnp.pad(v, (0, vw - v.shape[0]))   # zero-pad (BN0 invariant!)

    vec = jnp.stack([
        row(params["g0"]), row(params["b0"]),
        row(params["bias1"]), row(params["g1"]), row(params["b1"]),
        row(params["bias2"]), row(params["g2"]), row(params["b2"]),
        row(params["bias3"]),
    ])
    vec = jnp.pad(vec, ((0, VEC_ROWS - vec.shape[0]), (0, 0)))

    prepared = {"w1": w1, "w2": w2, "w3": w3, "vec": vec}
    return jax.device_put(prepared), action_dim


@functools.partial(jax.jit, static_argnames=("action_dim",))
def actor_forward(x, prepared, *, action_dim):
    batch, state_dim = x.shape
    sp = prepared["w1"].shape[0]
    ap = prepared["w3"].shape[1]

    x_p = x.astype(jnp.float32)
    if sp > state_dim:
        x_p = jnp.pad(x_p, ((0, 0), (0, sp - state_dim)))

    vmem_spec = pl.BlockSpec(memory_space=pltpu.MemorySpace.VMEM)
    out_p = pl.pallas_call(
        actor_kernel,
        out_shape=jax.ShapeDtypeStruct((batch, ap), jnp.float32),
        in_specs=[vmem_spec] * 5,
        out_specs=vmem_spec,
        compiler_params=pltpu.CompilerParams(
            # Let the (possible) zero-pad of x fuse into the pallas_call.
            allow_input_fusion=[True, False, False, False, False],
        ),
    )(x_p, prepared["w1"], prepared["w2"], prepared["w3"], prepared["vec"])

    return out_p[:, :action_dim]


def actor_reference(x, params):
    """Pure-JAX f32 reference (same math, no bf16 cast)."""
    def bn(h, g, b):
        m = jnp.mean(h, axis=0, keepdims=True)
        v = jnp.mean((h - m) ** 2, axis=0, keepdims=True)
        return (h - m) * jax.lax.rsqrt(v + BN_EPS) * g + b

    h = bn(x, params["g0"], params["b0"])
    h = jnp.maximum(h @ params["w1"] + params["bias1"], 0.0)
    h = bn(h, params["g1"], params["b1"])
    h = jnp.maximum(h @ params["w2"] + params["bias2"], 0.0)
    h = bn(h, params["g2"], params["b2"])
    return jnp.tanh(h @ params["w3"] + params["bias3"])


def init_actor_params(key, action_dim, state_dim):
    """Deterministic parameter init mirroring the PyTorch module's __init__."""
    ks = jax.random.split(key, 6)

    def uniform(k, shape, bound):
        return jax.random.uniform(
            k, shape, dtype=jnp.float32, minval=-bound, maxval=bound
        )

    # fanin_init uses weight.size()[0] == out_features (original code's quirk).
    w1_bound = 1.0 / jnp.sqrt(float(HID_LAYER1_DIM))
    w2_bound = 1.0 / jnp.sqrt(float(HID_LAYER2_DIM))
    # PyTorch Linear default bias init: U(-1/sqrt(in_features), 1/sqrt(in_features)).
    b1_bound = 1.0 / jnp.sqrt(float(state_dim))
    b2_bound = 1.0 / jnp.sqrt(float(HID_LAYER1_DIM))
    b3_bound = 1.0 / jnp.sqrt(float(HID_LAYER2_DIM))

    return {
        # BatchNorm affine params (PyTorch default: gamma=1, beta=0).
        "g0": jnp.ones((1, state_dim), jnp.float32),
        "b0": jnp.zeros((1, state_dim), jnp.float32),
        "g1": jnp.ones((1, HID_LAYER1_DIM), jnp.float32),
        "b1": jnp.zeros((1, HID_LAYER1_DIM), jnp.float32),
        "g2": jnp.ones((1, HID_LAYER2_DIM), jnp.float32),
        "b2": jnp.zeros((1, HID_LAYER2_DIM), jnp.float32),
        # Linear weights stored as (in, out) for x @ W.
        "w1": uniform(ks[0], (state_dim, HID_LAYER1_DIM), w1_bound),
        "bias1": uniform(ks[1], (1, HID_LAYER1_DIM), b1_bound),
        "w2": uniform(ks[2], (HID_LAYER1_DIM, HID_LAYER2_DIM), w2_bound),
        "bias2": uniform(ks[3], (1, HID_LAYER2_DIM), b2_bound),
        "w3": uniform(ks[4], (HID_LAYER2_DIM, action_dim), WFINAL),
        "bias3": uniform(ks[5], (1, action_dim), b3_bound),
    }


if __name__ == "__main__":
    key = jax.random.PRNGKey(0)
    k_params, k_x = jax.random.split(key)

    batch = 8
    state_dim = 16
    action_dim = 4

    params = init_actor_params(k_params, action_dim, state_dim)
    x = jax.random.normal(k_x, (batch, state_dim), dtype=jnp.float32)

    # One-time parameter preparation (pad / cast / pack), reused across calls.
    prepared, adim = prepare_params(params)

    action = actor_forward(x, prepared, action_dim=adim)
    jax.block_until_ready(action)

    # Call again to exercise the cached (no re-pack) fast path.
    action = actor_forward(x, prepared, action_dim=adim)
    jax.block_until_ready(action)

    assert action.shape == (batch, action_dim)
    assert bool(jnp.all(jnp.abs(action) <= 1.0))
    assert bool(jnp.all(jnp.isfinite(action)))

    # Loose tolerance: kernel uses bf16 matmul operands for fc1/fc2,
    # reference is pure f32 (fc3 is f32 in both).
    ref = actor_reference(x, params)
    assert bool(jnp.allclose(action, ref, atol=1e-2, rtol=5e-2))

    print("KERNEL_OK")
</pallas_src>

<mosaic_0001>
module attributes {stable_mosaic.version = 11 : i64} {
  func.func @actor_kernel(%arg0: memref<8x16xf32, #tpu.memory_space<vmem>>, %arg1: memref<16x256xbf16, #tpu.memory_space<vmem>>, %arg2: memref<256x128xbf16, #tpu.memory_space<vmem>>, %arg3: memref<128x128xf32, #tpu.memory_space<vmem>>, %arg4: memref<16x256xf32, #tpu.memory_space<vmem>>, %arg5: memref<8x128xf32, #tpu.memory_space<vmem>>) attributes {dimension_semantics = [], scalar_prefetch = 0 : i64, scratch_operands = 0 : i64, tpu.core_type = #tpu.core_type<tc>} {
    %c0 = arith.constant 0 : index
    %c0_0 = arith.constant 0 : index
    %0 = vector.load %arg4[%c0, %c0_0] : memref<16x256xf32, #tpu.memory_space<vmem>>, vector<1x16xf32>
    %c1 = arith.constant 1 : index
    %c0_1 = arith.constant 0 : index
    %1 = vector.load %arg4[%c1, %c0_1] : memref<16x256xf32, #tpu.memory_space<vmem>>, vector<1x16xf32>
    %c2 = arith.constant 2 : index
    %c0_2 = arith.constant 0 : index
    %2 = vector.load %arg4[%c2, %c0_2] : memref<16x256xf32, #tpu.memory_space<vmem>>, vector<1x256xf32>
    %c3 = arith.constant 3 : index
    %c0_3 = arith.constant 0 : index
    %3 = vector.load %arg4[%c3, %c0_3] : memref<16x256xf32, #tpu.memory_space<vmem>>, vector<1x256xf32>
    %c4 = arith.constant 4 : index
    %c0_4 = arith.constant 0 : index
    %4 = vector.load %arg4[%c4, %c0_4] : memref<16x256xf32, #tpu.memory_space<vmem>>, vector<1x256xf32>
    %c5 = arith.constant 5 : index
    %c0_5 = arith.constant 0 : index
    %5 = vector.load %arg4[%c5, %c0_5] : memref<16x256xf32, #tpu.memory_space<vmem>>, vector<1x128xf32>
    %c6 = arith.constant 6 : index
    %c0_6 = arith.constant 0 : index
    %6 = vector.load %arg4[%c6, %c0_6] : memref<16x256xf32, #tpu.memory_space<vmem>>, vector<1x128xf32>
    %c7 = arith.constant 7 : index
    %c0_7 = arith.constant 0 : index
    %7 = vector.load %arg4[%c7, %c0_7] : memref<16x256xf32, #tpu.memory_space<vmem>>, vector<1x128xf32>
    %c8 = arith.constant 8 : index
    %c0_8 = arith.constant 0 : index
    %8 = vector.load %arg4[%c8, %c0_8] : memref<16x256xf32, #tpu.memory_space<vmem>>, vector<1x128xf32>
    %c0_9 = arith.constant 0 : index
    %c0_10 = arith.constant 0 : index
    %9 = vector.load %arg0[%c0_9, %c0_10] : memref<8x16xf32, #tpu.memory_space<vmem>>, vector<8x16xf32>
    %cst = arith.constant dense<0.000000e+00> : vector<16xf32>
    %10 = vector.multi_reduction <add>, %9, %cst [0] : vector<8x16xf32> to vector<16xf32>
    %11 = vector.shape_cast %10 : vector<16xf32> to vector<1x16xf32>
    %cst_11 = arith.constant 8.000000e+00 : f32
    %12 = vector.broadcast %cst_11 : f32 to vector<1x16xf32>
    %13 = arith.divf %11, %12 : vector<1x16xf32>
    %14 = vector.broadcast %13 : vector<1x16xf32> to vector<8x16xf32>
    %15 = arith.subf %9, %14 : vector<8x16xf32>
    %16 = arith.mulf %15, %15 : vector<8x16xf32>
    %cst_12 = arith.constant dense<0.000000e+00> : vector<16xf32>
    %17 = vector.multi_reduction <add>, %16, %cst_12 [0] : vector<8x16xf32> to vector<16xf32>
    %18 = vector.shape_cast %17 : vector<16xf32> to vector<1x16xf32>
    %cst_13 = arith.constant 8.000000e+00 : f32
    %19 = vector.broadcast %cst_13 : f32 to vector<1x16xf32>
    %20 = arith.divf %18, %19 : vector<1x16xf32>
    %cst_14 = arith.constant 9.99999974E-6 : f32
    %21 = vector.broadcast %cst_14 : f32 to vector<1x16xf32>
    %22 = arith.addf %20, %21 : vector<1x16xf32>
    %23 = math.rsqrt %22 : vector<1x16xf32>
    %24 = vector.broadcast %23 : vector<1x16xf32> to vector<8x16xf32>
    %25 = arith.mulf %15, %24 : vector<8x16xf32>
    %26 = vector.broadcast %0 : vector<1x16xf32> to vector<8x16xf32>
    %27 = arith.mulf %25, %26 : vector<8x16xf32>
    %28 = vector.broadcast %1 : vector<1x16xf32> to vector<8x16xf32>
    %29 = arith.addf %27, %28 : vector<8x16xf32>
    %30 = arith.truncf %29 : vector<8x16xf32> to vector<8x16xbf16>
    %c0_15 = arith.constant 0 : index
    %c0_16 = arith.constant 0 : index
    %31 = vector.load %arg1[%c0_15, %c0_16] : memref<16x256xbf16, #tpu.memory_space<vmem>>, vector<16x256xbf16>
    %cst_17 = arith.constant dense<0.000000e+00> : vector<8x256xf32>
    %32 = tpu.matmul %30, %31, %cst_17 {dimension_numbers = #tpu.dot_dimension_numbers<[1], [0], [0], [1], [0, 0, 1, 1], [], []>} : vector<8x16xbf16>, vector<16x256xbf16>, vector<8x256xf32> -> vector<8x256xf32>
    %33 = vector.broadcast %2 : vector<1x256xf32> to vector<8x256xf32>
    %34 = arith.addf %32, %33 : vector<8x256xf32>
    %cst_18 = arith.constant 0.000000e+00 : f32
    %35 = vector.broadcast %cst_18 : f32 to vector<8x256xf32>
    %36 = arith.maximumf %34, %35 : vector<8x256xf32>
    %cst_19 = arith.constant dense<0.000000e+00> : vector<256xf32>
    %37 = vector.multi_reduction <add>, %36, %cst_19 [0] : vector<8x256xf32> to vector<256xf32>
    %38 = vector.shape_cast %37 : vector<256xf32> to vector<1x256xf32>
    %cst_20 = arith.constant 8.000000e+00 : f32
    %39 = vector.broadcast %cst_20 : f32 to vector<1x256xf32>
    %40 = arith.divf %38, %39 : vector<1x256xf32>
    %41 = vector.broadcast %40 : vector<1x256xf32> to vector<8x256xf32>
    %42 = arith.subf %36, %41 : vector<8x256xf32>
    %43 = arith.mulf %42, %42 : vector<8x256xf32>
    %cst_21 = arith.constant dense<0.000000e+00> : vector<256xf32>
    %44 = vector.multi_reduction <add>, %43, %cst_21 [0] : vector<8x256xf32> to vector<256xf32>
    %45 = vector.shape_cast %44 : vector<256xf32> to vector<1x256xf32>
    %cst_22 = arith.constant 8.000000e+00 : f32
    %46 = vector.broadcast %cst_22 : f32 to vector<1x256xf32>
    %47 = arith.divf %45, %46 : vector<1x256xf32>
    %cst_23 = arith.constant 9.99999974E-6 : f32
    %48 = vector.broadcast %cst_23 : f32 to vector<1x256xf32>
    %49 = arith.addf %47, %48 : vector<1x256xf32>
    %50 = math.rsqrt %49 : vector<1x256xf32>
    %51 = vector.broadcast %50 : vector<1x256xf32> to vector<8x256xf32>
    %52 = arith.mulf %42, %51 : vector<8x256xf32>
    %53 = vector.broadcast %3 : vector<1x256xf32> to vector<8x256xf32>
    %54 = arith.mulf %52, %53 : vector<8x256xf32>
    %55 = vector.broadcast %4 : vector<1x256xf32> to vector<8x256xf32>
    %56 = arith.addf %54, %55 : vector<8x256xf32>
    %57 = arith.truncf %56 : vector<8x256xf32> to vector<8x256xbf16>
    %c0_24 = arith.constant 0 : index
    %c0_25 = arith.constant 0 : index
    %58 = vector.load %arg2[%c0_24, %c0_25] : memref<256x128xbf16, #tpu.memory_space<vmem>>, vector<256x128xbf16>
    %cst_26 = arith.constant dense<0.000000e+00> : vector<8x128xf32>
    %59 = tpu.matmul %57, %58, %cst_26 {dimension_numbers = #tpu.dot_dimension_numbers<[1], [0], [0], [1], [0, 0, 1, 1], [], []>} : vector<8x256xbf16>, vector<256x128xbf16>, vector<8x128xf32> -> vector<8x128xf32>
    %60 = vector.broadcast %5 : vector<1x128xf32> to vector<8x128xf32>
    %61 = arith.addf %59, %60 : vector<8x128xf32>
    %cst_27 = arith.constant 0.000000e+00 : f32
    %62 = vector.broadcast %cst_27 : f32 to vector<8x128xf32>
    %63 = arith.maximumf %61, %62 : vector<8x128xf32>
    %cst_28 = arith.constant dense<0.000000e+00> : vector<128xf32>
    %64 = vector.multi_reduction <add>, %63, %cst_28 [0] : vector<8x128xf32> to vector<128xf32>
    %65 = vector.shape_cast %64 : vector<128xf32> to vector<1x128xf32>
    %cst_29 = arith.constant 8.000000e+00 : f32
    %66 = vector.broadcast %cst_29 : f32 to vector<1x128xf32>
    %67 = arith.divf %65, %66 : vector<1x128xf32>
    %68 = vector.broadcast %67 : vector<1x128xf32> to vector<8x128xf32>
    %69 = arith.subf %63, %68 : vector<8x128xf32>
    %70 = arith.mulf %69, %69 : vector<8x128xf32>
    %cst_30 = arith.constant dense<0.000000e+00> : vector<128xf32>
    %71 = vector.multi_reduction <add>, %70, %cst_30 [0] : vector<8x128xf32> to vector<128xf32>
    %72 = vector.shape_cast %71 : vector<128xf32> to vector<1x128xf32>
    %cst_31 = arith.constant 8.000000e+00 : f32
    %73 = vector.broadcast %cst_31 : f32 to vector<1x128xf32>
    %74 = arith.divf %72, %73 : vector<1x128xf32>
    %cst_32 = arith.constant 9.99999974E-6 : f32
    %75 = vector.broadcast %cst_32 : f32 to vector<1x128xf32>
    %76 = arith.addf %74, %75 : vector<1x128xf32>
    %77 = math.rsqrt %76 : vector<1x128xf32>
    %78 = vector.broadcast %77 : vector<1x128xf32> to vector<8x128xf32>
    %79 = arith.mulf %69, %78 : vector<8x128xf32>
    %80 = vector.broadcast %6 : vector<1x128xf32> to vector<8x128xf32>
    %81 = arith.mulf %79, %80 : vector<8x128xf32>
    %82 = vector.broadcast %7 : vector<1x128xf32> to vector<8x128xf32>
    %83 = arith.addf %81, %82 : vector<8x128xf32>
    %c0_33 = arith.constant 0 : index
    %c0_34 = arith.constant 0 : index
    %84 = vector.load %arg3[%c0_33, %c0_34] : memref<128x128xf32, #tpu.memory_space<vmem>>, vector<128x128xf32>
    %cst_35 = arith.constant dense<0.000000e+00> : vector<8x128xf32>
    %85 = tpu.matmul %83, %84, %cst_35 {dimension_numbers = #tpu.dot_dimension_numbers<[1], [0], [0], [1], [0, 0, 1, 1], [], []>} : vector<8x128xf32>, vector<128x128xf32>, vector<8x128xf32> -> vector<8x128xf32>
    %86 = vector.broadcast %8 : vector<1x128xf32> to vector<8x128xf32>
    %87 = arith.addf %85, %86 : vector<8x128xf32>
    %88 = math.tanh %87 : vector<8x128xf32>
    %c0_36 = arith.constant 0 : index
    %c0_37 = arith.constant 0 : index
    %89 = vector.load %arg5[%c0_36, %c0_37] : memref<8x128xf32, #tpu.memory_space<vmem>>, vector<8x128xf32>
    tpu.vector_store %arg5[%c0_36, %c0_37], %88 {strides = array<i32>} : memref<8x128xf32, #tpu.memory_space<vmem>>, vector<8x128xf32>,
    return
  }
}

</mosaic_0001>

<bundles_post_ra>
// kernel: actor_forward.1
= control target key start
LH: loop header
LB: loop body
LE: loop exit
PB: predicated region body
PF: predicated region fallthrough
CT: control target
= control target key end

     0   :  { %10 = vsyncpa [#allocation3], 0  ;;  %s817_s0 = inlined_call_operand.hbm [shape: f32[8,16], index: 0, kind: input, shape index: {}]   ;;  %s818_s1 = inlined_call_operand.hbm [shape: bf16[16,256], index: 1, kind: input, shape index: {}]   ;;  %s819_s2 = inlined_call_operand.hbm [shape: bf16[256,128], index: 2, kind: input, shape index: {}]   ;;  %s820_s3 = inlined_call_operand.hbm [shape: f32[128,128], index: 3, kind: input, shape index: {}]   ;;  %s821_s4 = inlined_call_operand.hbm [shape: f32[16,256], index: 4, kind: input, shape index: {}]   ;;  %s822_s5 = inlined_call_operand.vmem [shape: f32[8,128], index: 5, kind: output, shape index: {}]  }
   0x1   :  { %11 = vsyncpa [#allocation5], 0  ;;  %s28_s20 = sshll.u32 %s818_s1, 4  ;;  %s29_s20 = int_to_ptr.hbm [resolvable:$true] %s28_s20 }
   0x2   :  { %12 = vsyncpa [#allocation8], 0  ;;  %s743_s21 = smov [#allocation4]   ;;  %s54_s25 = sshll.u32 %s820_s3, 4  ;;  %s55_s25 = int_to_ptr.hbm [resolvable:$true] %s54_s25 }
   0x3   :  { %s30_s22 = sshll.u32 %s743_s21, 4  ;;  %s744_s26 = smov 128   ;;  %s31_s22 = int_to_ptr.vmem [resolvable:$true] %s30_s22 }
   0x4   :  { %s745_s27 = smov 8   ;;  %s746_s28 = smov [#allocation7]  }
   0x5   :  { %36 = dma.hbm_to_vmem [thread:$0]  %s29_s20, 256, %s31_s22, [#allocation5], %s744_s26, %s744_s26, %s745_s27  }
   0x6   :  { %s56_s29 = sshll.u32 %s746_s28, 4  ;;  %s18_s7 = sshll.u32 %s817_s0, 4  ;;  %s57_s29 = int_to_ptr.vmem [resolvable:$true] %s56_s29  ;;  %s19_s7 = int_to_ptr.hbm [resolvable:$true] %s18_s7 }
   0x7   :  { %62 = dma.hbm_to_vmem [thread:$0]  %s55_s25, 2048, %s57_s29, [#allocation8], %s744_s26, %s744_s26, %s745_s27  }
   0x8   :  { %s41_s9 = sshll.u32 %s819_s2, 4  ;;  %s747_s10 = smov [#allocation2]   ;;  %s42_s9 = int_to_ptr.hbm [resolvable:$true] %s41_s9 }
   0x9   :  { %s20_s11 = sshll.u32 %s747_s10, 4  ;;  %s748_s3 = smov [#allocation6]   ;;  %s21_s11 = int_to_ptr.vmem [resolvable:$true] %s20_s11 }
   0xa   :  { %23 = dma.hbm_to_vmem [thread:$0]  %s19_s7, 128, %s21_s11, [#allocation3]  }
   0xb   :  { %s43_s12 = sshll.u32 %s748_s3, 4  ;;  %s749_s13 = smov 64   ;;  %s44_s12 = int_to_ptr.vmem [resolvable:$true] %s43_s12 }
   0xc   :  { %s750_s14 = smov 4   ;;  %s67_s16 = sshll.u32 %s821_s4, 4  ;;  %s68_s16 = int_to_ptr.hbm [resolvable:$true] %s67_s16 }
   0xd   :  { %49 = dma.hbm_to_vmem [thread:$0]  %s42_s9, 2048, %s44_s12, [#allocation5], %s749_s13, %s749_s13, %s750_s14  }
   0xe   :  { %s751_s17 = smov [#allocation9]   ;;  %s752_s2 = smov 256  }
   0xf   :  { %s69_s18 = sshll.u32 %s751_s17, 4  ;;  %s753_s19 = smov 16   ;;  %s70_s18 = int_to_ptr.vmem [resolvable:$true] %s69_s18 }
  0x10   :  { %75 = dma.hbm_to_vmem [thread:$0]  %s68_s16, 512, %s70_s18, [#allocation8], %s752_s2, %s752_s2, %s753_s19  }
  0x11   :  { %737 = dma.done.wait [#allocation3], 128  }
  0x12   :  { %738 = vsyncadd [#allocation3], 4294967168 }
  0x13   :  { %739 = dma.done.wait [#allocation5], 2304  }
  0x14   :  { %740 = vsyncadd [#allocation5], 4294964992 }
  0x15   :  { %741 = dma.done.wait [#allocation8], 2560  }
  0x16   :  { %742 = vsyncadd [#allocation8], 4294964736  ;;  %v754_v0 = vmov 8.0   ;;  %vm110_vm0 = vcmask 130048   ;;  %v503_v2 = vld [vmem:[#allocation4] sm:$0xf] }
  0x17   :  { %605 = vrcp.f32 %v754_v0  ;;  %v576_v3 = vld [vmem:[#allocation4 + $0x4] sm:$0xf0]  ;;  %v575_v4 = vld [vmem:[#allocation4 + $0x4] sm:$0xf]  ;;  %v505_v6 = vld [vmem:[#allocation4 + $0x8] sm:$0xf0] }
  0x18   :  { %v504_v5 = vor.u32 %v576_v3, %v503_v2  ;;  %v508_v7 = vor.u32 %v575_v4, %v505_v6  ;;  %v109_v8 = vld [vmem:[#allocation2] sm:$0xff]  ;;  %v97_v39 = vld [vmem:[#allocation9] ss:$0 sm:$0xff]  ;;  %v98_v42 = vld [vmem:[#allocation9 + $0x1] ss:$0 sm:$0xff] }
  0x19   :  { %v111_v10 = vsel %vm110_vm0, %v109_v8, 0.0  ;;  %v100_v46 = vld [vmem:[#allocation9 + $0x2] ss:$8 sm:$0x3]  ;;  %v584_v51 = vld [vmem:[#allocation6 + $0x38] sm:$0xff]  ;;  %v583_v55 = vld [vmem:[#allocation6 + $0x30] sm:$0xff] }
  0x1a   :  { %178 = vmatpush.bf16.msra.mxu0 %v504_v5  ;;  %191 = vmatpush.bf16.msra.mxu1 %v508_v7  ;;  %v112_v11 = vrot.slane %v111_v10, 4  ;;  %v154_v47 = vperm.slane %v100_v46, 0  ;;  %v155_v48 = vperm.slane %v100_v46, 1  ;;  %v592_v52 = vld [vmem:[#allocation6 + $0x78] sm:$0xff]  ;;  %v591_v56 = vld [vmem:[#allocation6 + $0x70] sm:$0xff]  ;;  %v582_v61 = vld [vmem:[#allocation6 + $0x28] sm:$0xff] }
  0x1b   :  { %399 = vmatpush.bf16.msra.mxu2 %v584_v51  ;;  %412 = vmatpush.bf16.msra.mxu3 %v592_v52  ;;  %v590_v62 = vld [vmem:[#allocation6 + $0x68] sm:$0xff]  ;;  %v581_v5 = vld [vmem:[#allocation6 + $0x20] sm:$0xff] }
  0x1c   :  { %v113_v13 = vadd.f32 %v112_v11, %v111_v10  ;;  %v589_v6 = vld [vmem:[#allocation6 + $0x60] sm:$0xff]  ;;  %v580_v11 = vld [vmem:[#allocation6 + $0x18] sm:$0xff] }
  0x1d   :  { %v606_v1 = vpop.eup %605  ;;  %v102_v52 = vld [vmem:[#allocation9 + $0x3] ss:$8 sm:$0x3] }
  0x1e   :  { %v119_v9 = vmul.f32 8.0, %v606_v1  ;;  %v114_v15 = vrot.slane %v113_v13, 2  ;;  %vm123_vm1 = vweird.f32 %v606_v1 }
  0x1f   :  { %400 = vmatpush.bf16.msra.mxu2 %v583_v55  ;;  %413 = vmatpush.bf16.msra.mxu3 %v591_v56  ;;  %v104_v55 = vld [vmem:[#allocation9 + $0x4] ss:$8 sm:$0x3] }
  0x20   :  { %v120_v12 = vsub.f32 1.0, %v119_v9  ;;  %v115_v17 = vadd.f32 %v114_v15, %v113_v13 }
  0x22   :  { %v121_v14 = vmul.f32 %v606_v1, %v120_v12  ;;  %v116_v18 = vrot.slane %v115_v17, 1  ;;  %v588_v12 = vld [vmem:[#allocation6 + $0x58] sm:$0xff] }
  0x23   :  { %401 = vmatpush.bf16.msra.mxu2 %v582_v61  ;;  %414 = vmatpush.bf16.msra.mxu3 %v590_v62  ;;  %v263_v62 = vperm.slane %v104_v55, 0 }
  0x24   :  { %v122_v16 = vadd.f32 %v606_v1, %v121_v14  ;;  %v117_v20 = vadd.f32 %v116_v18, %v115_v17  ;;  %v579_v17 = vld [vmem:[#allocation6 + $0x10] sm:$0xff] }
  0x25   :  { %v587_v18 = vld [vmem:[#allocation6 + $0x50] sm:$0xff] }
  0x26   :  { %v801_v19 = vsel %vm123_vm1, %v606_v1, %v122_v16 }
  0x27   :  { %v125_v21 = vmul.f32 %v801_v19, %v117_v20  ;;  %402 = vmatpush.bf16.msra.mxu2 %v581_v5  ;;  %415 = vmatpush.bf16.msra.mxu3 %v589_v6 }
  0x29   :  { %v126_v22 = vsub.f32 %v109_v8, %v125_v21 }
  0x2b   :  { %v127_v23 = vmul.f32 %v126_v22, %v126_v22  ;;  %403 = vmatpush.bf16.msra.mxu2 %v580_v11  ;;  %416 = vmatpush.bf16.msra.mxu3 %v588_v12  ;;  %v471_v12 = vld [vmem:[#allocation7 + $0x78] sm:$0xff] }
  0x2c   :  { %472 = vmatpush.msrb.mxu0 %v471_v12 }
  0x2d   :  { %v128_v24 = vsel %vm110_vm0, %v127_v23, 0.0 }
  0x2e   :  { %v129_v25 = vrot.slane %v128_v24, 4 }
  0x2f   :  { %404 = vmatpush.bf16.msra.mxu2 %v579_v17  ;;  %417 = vmatpush.bf16.msra.mxu3 %v587_v18 }
  0x30   :  { %v130_v26 = vadd.f32 %v129_v25, %v128_v24  ;;  %v578_v24 = vld [vmem:[#allocation6 + $0x8] sm:$0xff] }
  0x31   :  { %v586_v25 = vld [vmem:[#allocation6 + $0x48] sm:$0xff] }
  0x32   :  { %v131_v27 = vrot.slane %v130_v26, 2 }
  0x33   :  { %405 = vmatpush.bf16.msra.mxu2 %v578_v24  ;;  %418 = vmatpush.bf16.msra.mxu3 %v586_v25  ;;  %v466_v25 = vld [vmem:[#allocation7 + $0x50] sm:$0xff] }
  0x34   :  { %v132_v28 = vadd.f32 %v131_v27, %v130_v26 }
  0x36   :  { %v133_v29 = vrot.slane %v132_v28, 1 }
  0x38   :  { %v134_v30 = vadd.f32 %v133_v29, %v132_v28 }
  0x3a   :  { %v135_v31 = vmul.f32 %v134_v30, %v801_v19  ;;  %v577_v30 = vld [vmem:[#allocation6] sm:$0xff] }
  0x3b   :  { %406 = vmatpush.bf16.msra.mxu2 %v577_v30 }
  0x3c   :  { %v136_v32 = vadd.f32 1e-05, %v135_v31  ;;  %v585_v31 = vld [vmem:[#allocation6 + $0x40] sm:$0xff] }
  0x3d   :  { %419 = vmatpush.bf16.msra.mxu3 %v585_v31  ;;  %v463_v31 = vld [vmem:[#allocation7 + $0x38] sm:$0xff] }
  0x3e   :  { %607 = vrsqrt.f32 %v136_v32  ;;  %vm143_vm2 = vweird.f32 %v136_v32 }
  0x44   :  { %v608_v33 = vpop.eup %607 }
  0x45   :  { %v138_v34 = vmul.f32 %v608_v33, %v136_v32  ;;  %vm144_vm3 = vweird.f32 %v608_v33 }
  0x46   :  { %vm145_vm4 = vmor %vm143_vm2, %vm144_vm3 }
  0x47   :  { %v139_v35 = vmul.f32 %v608_v33, %v138_v34 }
  0x49   :  { %v140_v36 = vmul.f32 0.5, %v139_v35 }
  0x4b   :  { %v141_v37 = vsub.f32 1.5, %v140_v36 }
  0x4d   :  { %v142_v38 = vmul.f32 %v608_v33, %v141_v37 }
  0x4f   :  { %v146_v40 = vsel %vm145_vm4, %v608_v33, %v142_v38 }
  0x50   :  { %v147_v41 = vmul.f32 %v146_v40, %v126_v22 }
  0x52   :  { %v148_v43 = vmul.f32 %v147_v41, %v97_v39 }
  0x54   :  { %v149_v44 = vadd.f32 %v148_v43, %v98_v42 }
  0x56   :  { %v150_v45 = vpack.c.bf16 %v149_v44, %v149_v44 }
  0x58   :  { %509 = vmatmul.msk.bf16.vlgmr.msra.gmra.mxu0 %vm110_vm0, %v150_v45  ;;  %510 = vmatmul.msk.bf16.vlgmr.msra.gmra.mxu1 %vm110_vm0, %v150_v45 }
  0xd5   :  { %v180_v49 = vpop.f32.mrf.mxu0  ;;  %v193_v50 = vpop.f32.mrf.mxu1 }
  0xd6   :  { %v181_v53 = vadd.f32 %v180_v49, %v154_v47  ;;  %v194_v54 = vadd.f32 %v193_v50, %v155_v48 }
  0xd8   :  { %v197_v57 = vmax.f32 %v181_v53, 0.0  ;;  %v198_v58 = vmax.f32 %v194_v54, 0.0 }
  0xda   :  { %v199_v59 = vrot.slane %v197_v57, 4  ;;  %v205_v60 = vrot.slane %v198_v58, 4 }
  0xdc   :  { %v200_v63 = vadd.f32 %v199_v59, %v197_v57  ;;  %v206_v0 = vadd.f32 %v205_v60, %v198_v58  ;;  %v257_v60 = vperm.slane %v102_v52, 1 }
  0xdd   :  { %v182_v1 = vpop.f32.mrf.mxu0  ;;  %v195_v2 = vpop.f32.mrf.mxu1 }
  0xde   :  { %v201_v3 = vrot.slane %v200_v63, 2  ;;  %v207_v4 = vrot.slane %v206_v0, 2  ;;  %v264_v1 = vperm.slane %v104_v55, 1 }
  0xe0   :  { %v202_v7 = vadd.f32 %v201_v3, %v200_v63  ;;  %v208_v8 = vadd.f32 %v207_v4, %v206_v0 }
  0xe2   :  { %v203_v9 = vrot.slane %v202_v7, 1  ;;  %v209_v10 = vrot.slane %v208_v8, 1 }
  0xe4   :  { %v204_v13 = vadd.f32 %v203_v9, %v202_v7  ;;  %v210_v14 = vadd.f32 %v209_v10, %v208_v8  ;;  %v105_v8 = vld [vmem:[#allocation9 + $0x5] ss:$0 sm:$0xff] }
  0xe6   :  { %v211_v15 = vmul.f32 %v204_v13, %v801_v19  ;;  %v212_v16 = vmul.f32 %v210_v14, %v801_v19  ;;  %v470_v14 = vld [vmem:[#allocation7 + $0x70] sm:$0xff] }
  0xe7   :  { %473 = vmatpush.msrb.mxu0 %v470_v14 }
  0xe8   :  { %v213_v20 = vsub.f32 %v197_v57, %v211_v15  ;;  %v214_v21 = vsub.f32 %v198_v58, %v212_v16  ;;  %v256_v57 = vperm.slane %v102_v52, 0  ;;  %v469_v16 = vld [vmem:[#allocation7 + $0x68] sm:$0xff] }
  0xe9   :  { %474 = vmatpush.msrb.mxu0 %v469_v16 }
  0xea   :  { %v215_v22 = vmul.f32 %v213_v20, %v213_v20  ;;  %v216_v23 = vmul.f32 %v214_v21, %v214_v21 }
  0xec   :  { %v217_v26 = vrot.slane %v215_v22, 4  ;;  %v223_v27 = vrot.slane %v216_v23, 4 }
  0xee   :  { %v218_v28 = vadd.f32 %v217_v26, %v215_v22  ;;  %v224_v29 = vadd.f32 %v223_v27, %v216_v23  ;;  %v467_v23 = vld [vmem:[#allocation7 + $0x58] sm:$0xff]  ;;  %v465_v27 = vld [vmem:[#allocation7 + $0x48] sm:$0xff] }
  0xf0   :  { %v219_v32 = vrot.slane %v218_v28, 2  ;;  %v225_v33 = vrot.slane %v224_v29, 2 }
  0xf2   :  { %v220_v34 = vadd.f32 %v219_v32, %v218_v28  ;;  %v226_v35 = vadd.f32 %v225_v33, %v224_v29  ;;  %v464_v29 = vld [vmem:[#allocation7 + $0x40] sm:$0xff]  ;;  %v462_v33 = vld [vmem:[#allocation7 + $0x30] sm:$0xff] }
  0xf4   :  { %v221_v36 = vrot.slane %v220_v34, 1  ;;  %v227_v37 = vrot.slane %v226_v35, 1 }
  0xf6   :  { %v222_v38 = vadd.f32 %v221_v36, %v220_v34  ;;  %v228_v39 = vadd.f32 %v227_v37, %v226_v35  ;;  %v461_v35 = vld [vmem:[#allocation7 + $0x28] sm:$0xff]  ;;  %v460_v37 = vld [vmem:[#allocation7 + $0x20] sm:$0xff] }
  0xf8   :  { %v229_v40 = vmul.f32 %v222_v38, %v801_v19  ;;  %v230_v41 = vmul.f32 %v228_v39, %v801_v19  ;;  %v459_v39 = vld [vmem:[#allocation7 + $0x18] sm:$0xff] }
  0xfa   :  { %v231_v42 = vadd.f32 1e-05, %v229_v40  ;;  %v232_v43 = vadd.f32 1e-05, %v230_v41  ;;  %v458_v41 = vld [vmem:[#allocation7 + $0x10] sm:$0xff] }
  0xfc   :  { %609 = vrsqrt.f32 %v231_v42  ;;  %vm239_vm7 = vweird.f32 %v231_v42  ;;  %vm249_vm9 = vweird.f32 %v232_v43 }
  0xfd   :  { %611 = vrsqrt.f32 %v232_v43 }
 0x102   :  { %v610_v44 = vpop.eup %609 }
 0x103   :  { %v612_v45 = vpop.eup %611  ;;  %v234_v46 = vmul.f32 %v610_v44, %v231_v42  ;;  %vm240_vm5 = vweird.f32 %v610_v44  ;;  %v457_v42 = vld [vmem:[#allocation7 + $0x8] sm:$0xff] }
 0x104   :  { %v244_v47 = vmul.f32 %v612_v45, %v232_v43  ;;  %vm250_vm6 = vweird.f32 %v612_v45  ;;  %vm241_vm8 = vmor %vm239_vm7, %vm240_vm5 }
 0x105   :  { %v235_v48 = vmul.f32 %v610_v44, %v234_v46  ;;  %vm251_vm10 = vmor %vm249_vm9, %vm250_vm6 }
 0x106   :  { %v245_v49 = vmul.f32 %v612_v45, %v244_v47 }
 0x107   :  { %v236_v50 = vmul.f32 0.5, %v235_v48 }
 0x108   :  { %v246_v51 = vmul.f32 0.5, %v245_v49 }
 0x109   :  { %v237_v53 = vsub.f32 1.5, %v236_v50 }
 0x10a   :  { %v247_v54 = vsub.f32 1.5, %v246_v51 }
 0x10b   :  { %v238_v56 = vmul.f32 %v610_v44, %v237_v53 }
 0x10c   :  { %v248_v58 = vmul.f32 %v612_v45, %v247_v54 }
 0x10d   :  { %v242_v59 = vsel %vm241_vm8, %v610_v44, %v238_v56  ;;  %v456_v44 = vld [vmem:[#allocation7] sm:$0xff] }
 0x10e   :  { %v253_v61 = vmul.f32 %v242_v59, %v213_v20  ;;  %v252_v63 = vsel %vm251_vm10, %v612_v45, %v248_v58  ;;  %v468_v20 = vld [vmem:[#allocation7 + $0x60] sm:$0xff] }
 0x10f   :  { %v254_v0 = vmul.f32 %v252_v63, %v214_v21  ;;  %475 = vmatpush.msrb.mxu0 %v468_v20  ;;  %v107_v59 = vld [vmem:[#allocation9 + $0x7] ss:$0 sm:$0xff] }
 0x110   :  { %v260_v2 = vmul.f32 %v256_v57, %v253_v61  ;;  %v106_v57 = vld [vmem:[#allocation9 + $0x6] ss:$0 sm:$0xff] }
 0x111   :  { %v261_v3 = vmul.f32 %v257_v60, %v254_v0  ;;  %476 = vmatpush.msrb.mxu0 %v467_v23 }
 0x112   :  { %v267_v4 = vadd.f32 %v263_v62, %v260_v2  ;;  %v108_v62 = vld [vmem:[#allocation9 + $0x10] ss:$0 sm:$0xff] }
 0x113   :  { %v268_v5 = vadd.f32 %v264_v1, %v261_v3  ;;  %477 = vmatpush.msrb.mxu0 %v466_v25 }
 0x114   :  { %v269_v6 = vpack.c.bf16 %v267_v4, %v267_v4 }
 0x115   :  { %v270_v7 = vpack.c.bf16 %v268_v5, %v268_v5  ;;  %478 = vmatpush.msrb.mxu0 %v465_v27 }
 0x116   :  { %407 = vmatmul.bf16.vlgmr.msra.gmra.mxu2 %v269_v6 }
 0x117   :  { %420 = vmatmul.bf16.vlgmr.msra.gmra.mxu3 %v270_v7  ;;  %479 = vmatpush.msrb.mxu0 %v464_v29 }
 0x119   :  { %480 = vmatpush.msrb.mxu0 %v463_v31 }
 0x11b   :  { %481 = vmatpush.msrb.mxu0 %v462_v33 }
 0x11d   :  { %482 = vmatpush.msrb.mxu0 %v461_v35 }
 0x11f   :  { %483 = vmatpush.msrb.mxu0 %v460_v37 }
 0x121   :  { %484 = vmatpush.msrb.mxu0 %v459_v39 }
 0x123   :  { %485 = vmatpush.msrb.mxu0 %v458_v41 }
 0x125   :  { %486 = vmatpush.msrb.mxu0 %v457_v42 }
 0x127   :  { %487 = vmatpush.msrb.mxu0 %v456_v44 }
 0x199   :  { %v408_v9 = vpop.f32.mrf.mxu2 }
 0x19a   :  { %v409_v10 = vadd.f32 %v408_v9, %v105_v8  ;;  %v421_v11 = vpop.f32.mrf.mxu3 }
 0x19c   :  { %v422_v13 = vadd.f32 %v421_v11, %v409_v10 }
 0x19e   :  { %v425_v15 = vmax.f32 %v422_v13, 0.0 }
 0x1a0   :  { %v426_v17 = vrot.slane %v425_v15, 4 }
 0x1a1   :  { %v410_v18 = vpop.f32.mrf.mxu2 }
 0x1a2   :  { %v427_v21 = vadd.f32 %v426_v17, %v425_v15  ;;  %v423_v22 = vpop.f32.mrf.mxu3 }
 0x1a4   :  { %v428_v24 = vrot.slane %v427_v21, 2 }
 0x1a6   :  { %v429_v26 = vadd.f32 %v428_v24, %v427_v21 }
 0x1a8   :  { %v430_v28 = vrot.slane %v429_v26, 1 }
 0x1aa   :  { %v431_v30 = vadd.f32 %v430_v28, %v429_v26 }
 0x1ac   :  { %v432_v32 = vmul.f32 %v431_v30, %v801_v19 }
 0x1ae   :  { %v433_v34 = vsub.f32 %v425_v15, %v432_v32 }
 0x1b0   :  { %v434_v36 = vmul.f32 %v433_v34, %v433_v34 }
 0x1b2   :  { %v435_v38 = vrot.slane %v434_v36, 4 }
 0x1b4   :  { %v436_v40 = vadd.f32 %v435_v38, %v434_v36 }
 0x1b6   :  { %v437_v43 = vrot.slane %v436_v40, 2 }
 0x1b8   :  { %v438_v45 = vadd.f32 %v437_v43, %v436_v40 }
 0x1ba   :  { %v439_v46 = vrot.slane %v438_v45, 1 }
 0x1bc   :  { %v440_v47 = vadd.f32 %v439_v46, %v438_v45 }
 0x1be   :  { %v441_v48 = vmul.f32 %v440_v47, %v801_v19 }
 0x1c0   :  { %v442_v49 = vadd.f32 1e-05, %v441_v48 }
 0x1c2   :  { %613 = vrsqrt.f32 %v442_v49  ;;  %vm449_vm12 = vweird.f32 %v442_v49 }
 0x1c8   :  { %v614_v50 = vpop.eup %613 }
 0x1c9   :  { %v444_v51 = vmul.f32 %v614_v50, %v442_v49  ;;  %vm450_vm11 = vweird.f32 %v614_v50 }
 0x1ca   :  { %vm451_vm13 = vmor %vm449_vm12, %vm450_vm11 }
 0x1cb   :  { %v445_v52 = vmul.f32 %v614_v50, %v444_v51 }
 0x1cd   :  { %v446_v53 = vmul.f32 0.5, %v445_v52 }
 0x1cf   :  { %v447_v54 = vsub.f32 1.5, %v446_v53 }
 0x1d1   :  { %v448_v55 = vmul.f32 %v614_v50, %v447_v54 }
 0x1d3   :  { %v452_v56 = vsel %vm451_vm13, %v614_v50, %v448_v55 }
 0x1d4   :  { %v453_v58 = vmul.f32 %v452_v56, %v433_v34 }
 0x1d6   :  { %v454_v60 = vmul.f32 %v453_v58, %v106_v57 }
 0x1d8   :  { %v455_v61 = vadd.f32 %v454_v60, %v107_v59 }
 0x1da   :  { %488 = vmatmul.f32.vlgmr.msrb.gmra.mxu0 %v455_v61 }
 0x257   :  { %v489_v19 = vpop.f32.mrf.mxu0 }
 0x258   :  { %v490_v63 = vadd.f32 %v489_v19, %v108_v62 }
 0x25a   :  { %615 = vtanh.f32 %v490_v63 }
 0x260   :  { %v616_v0 = vpop.eup %615 }
 0x261   :  { %493 = vst [vmem:[%s822_s5] sm:$0xff] %v616_v0 }
 0x262   :  { %498 = vsyncpa [#allocation3], 1 }
 0x263   :  { %499 = vsyncpa [#allocation5], 1 }
 0x264   :  { %500 = vsyncpa [#allocation8], 1 }

</bundles_post_ra>
